<compile_context>
chip_gen: v7x
topology: tpu7x:2x2x1
jax: 0.10.0
libtpu: 0.0.40
codegen_flags: <defaults>
</compile_context>

<pallas_src>
import functools

import jax
import jax.numpy as jnp
from jax import lax
from jax.experimental import pallas as pl
from jax.experimental.pallas import tpu as pltpu

EPS = 1e-5  # PyTorch InstanceNorm2d default eps


def post_res_block_kernel(x_ref, p_ref, w2_ref, out_ref, *, H, W):
    R, HW = out_ref.shape            # R = bps*Cout sublane-folded rows, HW lane-dense
    K1 = x_ref.shape[0]              # bps*Cin
    inv_hw = 1.0 / float(HW)

    x = x_ref[...].astype(jnp.float32)                 # (K1, HW)

    # Packed small params: [w1 | wd | w3 | g1 b1 g2 b2 g3 b3]
    w1 = p_ref[:, 0:K1]
    wd = p_ref[:, K1:2 * K1]
    w3 = p_ref[:, 2 * K1:2 * K1 + R]
    vecs = p_ref[:, 2 * K1 + R:2 * K1 + R + 6]
    g1, b1 = vecs[:, 0:1], vecs[:, 1:2]
    g2, b2 = vecs[:, 2:3], vecs[:, 3:4]
    g3, b3 = vecs[:, 4:5], vecs[:, 5:6]

    def inorm(y, gamma, beta):
        # One-pass stats: two independent lane reductions; f32 throughout.
        # E[y^2]-mean^2 cancellation is benign here (tanh-bounded / normalized
        # inputs keep values O(1)).
        s = jnp.sum(y, axis=1, keepdims=True)
        q = jnp.sum(y * y, axis=1, keepdims=True)
        mean = s * inv_hw
        var = q * inv_hw - mean * mean                 # biased var (PyTorch IN)
        scale = lax.rsqrt(var + EPS)
        if gamma is not None:
            scale = scale * gamma
            shift = beta - mean * scale
        else:
            shift = -(mean * scale)
        return y * scale + shift

    # ---------- main branch: tanh -> conv1 (1x1, block-diag) -> norm1 ----------
    a = jnp.tanh(x)
    y = jnp.dot(w1, a, preferred_element_type=jnp.float32)          # (R, HW)
    y = inorm(y, g1, b1)

    # ---------- tanh -> conv2 (3x3, stride 1, reflect pad 1) -> norm2 ----------
    a2 = jnp.tanh(y)

    # Boundary masks, hoisted once per grid step; shift/AND when H, W are pow2.
    lane = lax.broadcasted_iota(jnp.int32, (R, HW), 1)
    if (W & (W - 1)) == 0 and (H & (H - 1)) == 0:
        ww = lane & (W - 1)
        hh = lane >> (W.bit_length() - 1)
    else:
        hh = lane // W
        ww = lane - hh * W
    top, bottom = hh == 0, hh == H - 1
    left, right = ww == 0, ww == W - 1

    # Circular lane rotations (jnp.roll semantics); wrapped values are replaced
    # by the reflect fix-ups below, so per-row (per-image) wraparound is harmless.
    up = pltpu.roll(a2, shift=W, axis=1)            # row h-1 (wraps at h==0)
    down = pltpu.roll(a2, shift=HW - W, axis=1)     # row h+1 (wraps at h==H-1)
    rows = (jnp.where(top, down, up),               # kh=0: reflect(h-1)
            a2,                                     # kh=1
            jnp.where(bottom, up, down))            # kh=2: reflect(h+1)

    # Tap-by-tap accumulation: each shifted window is matmul'd and discarded
    # immediately (no im2col concat), bounding live vregs.
    acc = None
    t = 0
    for r in rows:
        lft = pltpu.roll(r, shift=1, axis=1)        # col w-1
        rgt = pltpu.roll(r, shift=HW - 1, axis=1)   # col w+1
        for tap in (jnp.where(left, rgt, lft),      # kw=0: reflect(w-1)
                    r,                              # kw=1
                    jnp.where(right, lft, rgt)):    # kw=2: reflect(w+1)
            w_t = w2_ref[:, t * R:(t + 1) * R]      # (R, R) block-diag tap weight
            part = jnp.dot(w_t, tap, preferred_element_type=jnp.float32)
            acc = part if acc is None else acc + part
            t += 1
    y = inorm(acc, g2, b2)

    # ---------- tanh -> conv3 (1x1) -> norm3 ----------
    a3 = jnp.tanh(y)
    y = jnp.dot(w3, a3, preferred_element_type=jnp.float32)
    y = inorm(y, g3, b3)

    # ---------- downsample: 1x1 conv + InstanceNorm (affine=False) ----------
    # Conv bias folded away: exact ONLY because this norm has affine=False, so
    # the per-channel constant cancels in the mean subtraction.
    d = jnp.dot(wd, x, preferred_element_type=jnp.float32)
    d = inorm(d, None, None)

    # conv_first=False forces pre_norm=pre_act=True -> plain addition at the end.
    out_ref[...] = (d + y).astype(out_ref.dtype)    # lane-dense (R, HW) store


def post_res_block(x_nchw, params, *, batch_per_step=2):
    """x_nchw: (B, Cin, H, W) float32 (PyTorch layout). Returns (B, Cout, H, W).

    Assumes stride=1 and H, W >= 2 (reflect pad); downsample InstanceNorm must be
    affine=False (PyTorch default) for the folded conv bias to be exact.
    """
    B, Cin, H, W = x_nchw.shape
    Cout = params["w1"].shape[0]
    HW = H * W
    assert H >= 2 and W >= 2, "reflect pad 1 needs H, W >= 2"

    # On single-TC v5e/v6e pack several batch elements per grid step; on v7x
    # with tiny B prefer batch_per_step=1 so both TensorCores get work.
    bps = batch_per_step if (batch_per_step > 0 and B % batch_per_step == 0) else 1
    R, K1 = bps * Cout, bps * Cin

    eye = jnp.eye(bps, dtype=jnp.float32)
    w1_bd = jnp.kron(eye, params["w1"])                       # (R, K1) block-diag
    wd_bd = jnp.kron(eye, params["wd"])                       # (R, K1)
    w3_bd = jnp.kron(eye, params["w3"])                       # (R, R)
    vecs = jnp.stack([params["g1"], params["b1"],
                      params["g2"], params["b2"],
                      params["g3"], params["b3"]], axis=1)    # (Cout, 6)
    packed = jnp.concatenate(
        [w1_bd, wd_bd, w3_bd, jnp.tile(vecs, (bps, 1))], axis=1)   # (R, 2*K1+R+6)

    # 3x3 weights: per-tap block-diagonal matrices, taps ordered (kh, kw).
    w2_bd = jnp.concatenate(
        [jnp.kron(eye, params["w2"][:, :, kh, kw])
         for kh in range(3) for kw in range(3)], axis=1)      # (R, 9*R)

    x_g = x_nchw.reshape(B // bps, K1, HW)                    # sublane-folded groups

    out = pl.pallas_call(
        functools.partial(post_res_block_kernel, H=H, W=W),
        out_shape=jax.ShapeDtypeStruct((B // bps, R, HW), jnp.float32),
        grid=(B // bps,),
        in_specs=[
            pl.BlockSpec((None, K1, HW), lambda g: (g, 0, 0)),     # x batch group
            pl.BlockSpec((R, 2 * K1 + R + 6), lambda g: (0, 0)),   # packed small params
            pl.BlockSpec((R, 9 * R), lambda g: (0, 0)),            # w2 tap weights
        ],
        out_specs=pl.BlockSpec((None, R, HW), lambda g: (g, 0, 0)),
        compiler_params=pltpu.CompilerParams(
            dimension_semantics=("parallel",)),   # batch groups independent
    )(x_g, packed, w2_bd)
    return out.reshape(B, Cout, H, W)


def ref_forward(x_nchw, p):
    """Pure-JAX NCHW reference of the same forward pass."""
    def inorm(y, gamma=None, beta=None):
        mean = y.mean(axis=(2, 3), keepdims=True)
        var = ((y - mean) ** 2).mean(axis=(2, 3), keepdims=True)
        yn = (y - mean) / jnp.sqrt(var + EPS)
        if gamma is not None:
            yn = yn * gamma.reshape(1, -1, 1, 1) + beta.reshape(1, -1, 1, 1)
        return yn

    x = x_nchw
    a = jnp.tanh(x)
    y = jnp.einsum("bchw,oc->bohw", a, p["w1"])
    y = inorm(y, p["g1"], p["b1"])
    a = jnp.tanh(y)
    ap = jnp.pad(a, ((0, 0), (0, 0), (1, 1), (1, 1)), mode="reflect")
    y = lax.conv_general_dilated(ap, p["w2"], (1, 1), "VALID",
                                 dimension_numbers=("NCHW", "OIHW", "NCHW"))
    y = inorm(y, p["g2"], p["b2"])
    a = jnp.tanh(y)
    y = jnp.einsum("bchw,oc->bohw", a, p["w3"])
    y = inorm(y, p["g3"], p["b3"])
    d = jnp.einsum("bchw,oc->bohw", x, p["wd"]) + p["bd"].reshape(1, -1, 1, 1)
    d = inorm(d)
    return d + y


if __name__ == "__main__":
    # Small shapes consistent with the module: B=2, channel_in=4, channel_out=8,
    # spatial 16x16, stride=1.
    B, Cin, Cout, H, W = 2, 4, 8, 16, 16
    key = jax.random.PRNGKey(0)
    ks = jax.random.split(key, 12)

    x = jax.random.normal(ks[0], (B, Cin, H, W), jnp.float32)   # PyTorch NCHW input

    params = {
        "w1": 0.3 * jax.random.normal(ks[1], (Cout, Cin), jnp.float32),          # (out,in)
        "w2": 0.2 * jax.random.normal(ks[2], (Cout, Cout, 3, 3), jnp.float32),   # OIHW
        "w3": 0.3 * jax.random.normal(ks[3], (Cout, Cout), jnp.float32),
        "wd": 0.3 * jax.random.normal(ks[4], (Cout, Cin), jnp.float32),
        "bd": 0.1 * jax.random.normal(ks[5], (Cout,), jnp.float32),
        "g1": 1.0 + 0.1 * jax.random.normal(ks[6], (Cout,), jnp.float32),
        "b1": 0.1 * jax.random.normal(ks[7], (Cout,), jnp.float32),
        "g2": 1.0 + 0.1 * jax.random.normal(ks[8], (Cout,), jnp.float32),
        "b2": 0.1 * jax.random.normal(ks[9], (Cout,), jnp.float32),
        "g3": 1.0 + 0.1 * jax.random.normal(ks[10], (Cout,), jnp.float32),
        "b3": 0.1 * jax.random.normal(ks[11], (Cout,), jnp.float32),
    }

    out = post_res_block(x, params)
    out = jax.block_until_ready(out)

    ref = ref_forward(x, params)
    err = float(jnp.max(jnp.abs(out - ref)))
    assert out.shape == (B, Cout, H, W), out.shape
    assert err < 1e-3, f"max abs err {err}"
    print("KERNEL_OK")
</pallas_src>

<mosaic_0001>
module attributes {stable_mosaic.version = 11 : i64} {
  func.func @post_res_block_kernel(%arg0: i32, %arg1: memref<1x8x256xf32, #tpu.memory_space<vmem>>, %arg2: memref<16x38xf32, #tpu.memory_space<vmem>>, %arg3: memref<16x144xf32, #tpu.memory_space<vmem>>, %arg4: memref<1x16x256xf32, #tpu.memory_space<vmem>>) attributes {dimension_semantics = [#tpu.dimension_semantics<parallel>], iteration_bounds = array<i64: 1>, scalar_prefetch = 0 : i64, scratch_operands = 0 : i64, tpu.core_type = #tpu.core_type<tc>, window_params = [{transform_indices = @transform_0, window_bounds = array<i64: 1, 8, 256>}, {pipeline_mode = #tpu.pipeline_mode<synchronous>, transform_indices = @transform_1, window_bounds = array<i64: 16, 38>}, {pipeline_mode = #tpu.pipeline_mode<synchronous>, transform_indices = @transform_2, window_bounds = array<i64: 16, 144>}, {transform_indices = @transform_3, window_bounds = array<i64: 1, 16, 256>}]} {
    %c0 = arith.constant 0 : index
    %c0_0 = arith.constant 0 : index
    %c0_1 = arith.constant 0 : index
    %0 = vector.load %arg1[%c0, %c0_0, %c0_1] : memref<1x8x256xf32, #tpu.memory_space<vmem>>, vector<1x8x256xf32>
    %1 = vector.shape_cast %0 : vector<1x8x256xf32> to vector<8x256xf32>
    %c0_2 = arith.constant 0 : index
    %c0_3 = arith.constant 0 : index
    %2 = vector.load %arg2[%c0_2, %c0_3] : memref<16x38xf32, #tpu.memory_space<vmem>>, vector<16x8xf32>
    %c0_4 = arith.constant 0 : index
    %c8 = arith.constant 8 : index
    %3 = vector.load %arg2[%c0_4, %c8] : memref<16x38xf32, #tpu.memory_space<vmem>>, vector<16x8xf32>
    %c0_5 = arith.constant 0 : index
    %c16 = arith.constant 16 : index
    %4 = vector.load %arg2[%c0_5, %c16] : memref<16x38xf32, #tpu.memory_space<vmem>>, vector<16x16xf32>
    %c0_6 = arith.constant 0 : index
    %c32 = arith.constant 32 : index
    %5 = vector.load %arg2[%c0_6, %c32] : memref<16x38xf32, #tpu.memory_space<vmem>>, vector<16x6xf32>
    %6 = vector.extract_strided_slice %5 {offsets = [0, 0], sizes = [16, 1], strides = [1, 1]} : vector<16x6xf32> to vector<16x1xf32>
    %7 = vector.extract_strided_slice %5 {offsets = [0, 1], sizes = [16, 1], strides = [1, 1]} : vector<16x6xf32> to vector<16x1xf32>
    %8 = vector.extract_strided_slice %5 {offsets = [0, 2], sizes = [16, 1], strides = [1, 1]} : vector<16x6xf32> to vector<16x1xf32>
    %9 = vector.extract_strided_slice %5 {offsets = [0, 3], sizes = [16, 1], strides = [1, 1]} : vector<16x6xf32> to vector<16x1xf32>
    %10 = vector.extract_strided_slice %5 {offsets = [0, 4], sizes = [16, 1], strides = [1, 1]} : vector<16x6xf32> to vector<16x1xf32>
    %11 = vector.extract_strided_slice %5 {offsets = [0, 5], sizes = [16, 1], strides = [1, 1]} : vector<16x6xf32> to vector<16x1xf32>
    %12 = math.tanh %1 : vector<8x256xf32>
    %cst = arith.constant dense<0.000000e+00> : vector<16x256xf32>
    %13 = tpu.matmul %2, %12, %cst {dimension_numbers = #tpu.dot_dimension_numbers<[1], [0], [0], [1], [0, 0, 1, 1], [], []>} : vector<16x8xf32>, vector<8x256xf32>, vector<16x256xf32> -> vector<16x256xf32>
    %cst_7 = arith.constant dense<0.000000e+00> : vector<16xf32>
    %14 = vector.multi_reduction <add>, %13, %cst_7 [1] : vector<16x256xf32> to vector<16xf32>
    %15 = vector.shape_cast %14 : vector<16xf32> to vector<16x1xf32>
    %16 = arith.mulf %13, %13 : vector<16x256xf32>
    %cst_8 = arith.constant dense<0.000000e+00> : vector<16xf32>
    %17 = vector.multi_reduction <add>, %16, %cst_8 [1] : vector<16x256xf32> to vector<16xf32>
    %18 = vector.shape_cast %17 : vector<16xf32> to vector<16x1xf32>
    %cst_9 = arith.constant 3.906250e-03 : f32
    %19 = vector.broadcast %cst_9 : f32 to vector<16x1xf32>
    %20 = arith.mulf %15, %19 : vector<16x1xf32>
    %cst_10 = arith.constant 3.906250e-03 : f32
    %21 = vector.broadcast %cst_10 : f32 to vector<16x1xf32>
    %22 = arith.mulf %18, %21 : vector<16x1xf32>
    %23 = arith.mulf %20, %20 : vector<16x1xf32>
    %24 = arith.subf %22, %23 : vector<16x1xf32>
    %cst_11 = arith.constant 9.99999974E-6 : f32
    %25 = vector.broadcast %cst_11 : f32 to vector<16x1xf32>
    %26 = arith.addf %24, %25 : vector<16x1xf32>
    %27 = math.rsqrt %26 : vector<16x1xf32>
    %28 = arith.mulf %27, %6 : vector<16x1xf32>
    %29 = arith.mulf %20, %28 : vector<16x1xf32>
    %30 = arith.subf %7, %29 : vector<16x1xf32>
    %31 = vector.broadcast %28 : vector<16x1xf32> to vector<16x256xf32>
    %32 = arith.mulf %13, %31 : vector<16x256xf32>
    %33 = vector.broadcast %30 : vector<16x1xf32> to vector<16x256xf32>
    %34 = arith.addf %32, %33 : vector<16x256xf32>
    %35 = math.tanh %34 : vector<16x256xf32>
    %36 = tpu.iota {dimensions = array<i32: 1>} : vector<16x256xi32>
    %c15_i32 = arith.constant 15 : i32
    %37 = vector.broadcast %c15_i32 : i32 to vector<16x256xi32>
    %38 = arith.andi %36, %37 : vector<16x256xi32>
    %c4_i32 = arith.constant 4 : i32
    %39 = vector.broadcast %c4_i32 : i32 to vector<16x256xi32>
    %40 = arith.shrsi %36, %39 : vector<16x256xi32>
    %c0_i32 = arith.constant 0 : i32
    %41 = vector.broadcast %c0_i32 : i32 to vector<16x256xi32>
    %42 = arith.cmpi eq, %40, %41 : vector<16x256xi32>
    %c15_i32_12 = arith.constant 15 : i32
    %43 = vector.broadcast %c15_i32_12 : i32 to vector<16x256xi32>
    %44 = arith.cmpi eq, %40, %43 : vector<16x256xi32>
    %c0_i32_13 = arith.constant 0 : i32
    %45 = vector.broadcast %c0_i32_13 : i32 to vector<16x256xi32>
    %46 = arith.cmpi eq, %38, %45 : vector<16x256xi32>
    %c15_i32_14 = arith.constant 15 : i32
    %47 = vector.broadcast %c15_i32_14 : i32 to vector<16x256xi32>
    %48 = arith.cmpi eq, %38, %47 : vector<16x256xi32>
    %c16_i32 = arith.constant 16 : i32
    %49 = tpu.dynamic_rotate %35 by %c16_i32 dim 1 : vector<16x256xf32>, i32 -> vector<16x256xf32>
    %c240_i32 = arith.constant 240 : i32
    %50 = tpu.dynamic_rotate %35 by %c240_i32 dim 1 : vector<16x256xf32>, i32 -> vector<16x256xf32>
    %51 = arith.select %42, %50, %49 : vector<16x256xi1>, vector<16x256xf32>
    %52 = arith.select %44, %49, %50 : vector<16x256xi1>, vector<16x256xf32>
    %c1_i32 = arith.constant 1 : i32
    %53 = tpu.dynamic_rotate %51 by %c1_i32 dim 1 : vector<16x256xf32>, i32 -> vector<16x256xf32>
    %c255_i32 = arith.constant 255 : i32
    %54 = tpu.dynamic_rotate %51 by %c255_i32 dim 1 : vector<16x256xf32>, i32 -> vector<16x256xf32>
    %55 = arith.select %46, %54, %53 : vector<16x256xi1>, vector<16x256xf32>
    %56 = arith.select %48, %53, %54 : vector<16x256xi1>, vector<16x256xf32>
    %c0_15 = arith.constant 0 : index
    %c0_16 = arith.constant 0 : index
    %57 = vector.load %arg3[%c0_15, %c0_16] : memref<16x144xf32, #tpu.memory_space<vmem>>, vector<16x16xf32>
    %cst_17 = arith.constant dense<0.000000e+00> : vector<16x256xf32>
    %58 = tpu.matmul %57, %55, %cst_17 {dimension_numbers = #tpu.dot_dimension_numbers<[1], [0], [0], [1], [0, 0, 1, 1], [], []>} : vector<16x16xf32>, vector<16x256xf32>, vector<16x256xf32> -> vector<16x256xf32>
    %c0_18 = arith.constant 0 : index
    %c16_19 = arith.constant 16 : index
    %59 = vector.load %arg3[%c0_18, %c16_19] : memref<16x144xf32, #tpu.memory_space<vmem>>, vector<16x16xf32>
    %cst_20 = arith.constant dense<0.000000e+00> : vector<16x256xf32>
    %60 = tpu.matmul %59, %51, %cst_20 {dimension_numbers = #tpu.dot_dimension_numbers<[1], [0], [0], [1], [0, 0, 1, 1], [], []>} : vector<16x16xf32>, vector<16x256xf32>, vector<16x256xf32> -> vector<16x256xf32>
    %61 = arith.addf %58, %60 : vector<16x256xf32>
    %c0_21 = arith.constant 0 : index
    %c32_22 = arith.constant 32 : index
    %62 = vector.load %arg3[%c0_21, %c32_22] : memref<16x144xf32, #tpu.memory_space<vmem>>, vector<16x16xf32>
    %cst_23 = arith.constant dense<0.000000e+00> : vector<16x256xf32>
    %63 = tpu.matmul %62, %56, %cst_23 {dimension_numbers = #tpu.dot_dimension_numbers<[1], [0], [0], [1], [0, 0, 1, 1], [], []>} : vector<16x16xf32>, vector<16x256xf32>, vector<16x256xf32> -> vector<16x256xf32>
    %64 = arith.addf %61, %63 : vector<16x256xf32>
    %c1_i32_24 = arith.constant 1 : i32
    %65 = tpu.dynamic_rotate %35 by %c1_i32_24 dim 1 : vector<16x256xf32>, i32 -> vector<16x256xf32>
    %c255_i32_25 = arith.constant 255 : i32
    %66 = tpu.dynamic_rotate %35 by %c255_i32_25 dim 1 : vector<16x256xf32>, i32 -> vector<16x256xf32>
    %67 = arith.select %46, %66, %65 : vector<16x256xi1>, vector<16x256xf32>
    %68 = arith.select %48, %65, %66 : vector<16x256xi1>, vector<16x256xf32>
    %c0_26 = arith.constant 0 : index
    %c48 = arith.constant 48 : index
    %69 = vector.load %arg3[%c0_26, %c48] : memref<16x144xf32, #tpu.memory_space<vmem>>, vector<16x16xf32>
    %cst_27 = arith.constant dense<0.000000e+00> : vector<16x256xf32>
    %70 = tpu.matmul %69, %67, %cst_27 {dimension_numbers = #tpu.dot_dimension_numbers<[1], [0], [0], [1], [0, 0, 1, 1], [], []>} : vector<16x16xf32>, vector<16x256xf32>, vector<16x256xf32> -> vector<16x256xf32>
    %71 = arith.addf %64, %70 : vector<16x256xf32>
    %c0_28 = arith.constant 0 : index
    %c64 = arith.constant 64 : index
    %72 = vector.load %arg3[%c0_28, %c64] : memref<16x144xf32, #tpu.memory_space<vmem>>, vector<16x16xf32>
    %cst_29 = arith.constant dense<0.000000e+00> : vector<16x256xf32>
    %73 = tpu.matmul %72, %35, %cst_29 {dimension_numbers = #tpu.dot_dimension_numbers<[1], [0], [0], [1], [0, 0, 1, 1], [], []>} : vector<16x16xf32>, vector<16x256xf32>, vector<16x256xf32> -> vector<16x256xf32>
    %74 = arith.addf %71, %73 : vector<16x256xf32>
    %c0_30 = arith.constant 0 : index
    %c80 = arith.constant 80 : index
    %75 = vector.load %arg3[%c0_30, %c80] : memref<16x144xf32, #tpu.memory_space<vmem>>, vector<16x16xf32>
    %cst_31 = arith.constant dense<0.000000e+00> : vector<16x256xf32>
    %76 = tpu.matmul %75, %68, %cst_31 {dimension_numbers = #tpu.dot_dimension_numbers<[1], [0], [0], [1], [0, 0, 1, 1], [], []>} : vector<16x16xf32>, vector<16x256xf32>, vector<16x256xf32> -> vector<16x256xf32>
    %77 = arith.addf %74, %76 : vector<16x256xf32>
    %c1_i32_32 = arith.constant 1 : i32
    %78 = tpu.dynamic_rotate %52 by %c1_i32_32 dim 1 : vector<16x256xf32>, i32 -> vector<16x256xf32>
    %c255_i32_33 = arith.constant 255 : i32
    %79 = tpu.dynamic_rotate %52 by %c255_i32_33 dim 1 : vector<16x256xf32>, i32 -> vector<16x256xf32>
    %80 = arith.select %46, %79, %78 : vector<16x256xi1>, vector<16x256xf32>
    %81 = arith.select %48, %78, %79 : vector<16x256xi1>, vector<16x256xf32>
    %c0_34 = arith.constant 0 : index
    %c96 = arith.constant 96 : index
    %82 = vector.load %arg3[%c0_34, %c96] : memref<16x144xf32, #tpu.memory_space<vmem>>, vector<16x16xf32>
    %cst_35 = arith.constant dense<0.000000e+00> : vector<16x256xf32>
    %83 = tpu.matmul %82, %80, %cst_35 {dimension_numbers = #tpu.dot_dimension_numbers<[1], [0], [0], [1], [0, 0, 1, 1], [], []>} : vector<16x16xf32>, vector<16x256xf32>, vector<16x256xf32> -> vector<16x256xf32>
    %84 = arith.addf %77, %83 : vector<16x256xf32>
    %c0_36 = arith.constant 0 : index
    %c112 = arith.constant 112 : index
    %85 = vector.load %arg3[%c0_36, %c112] : memref<16x144xf32, #tpu.memory_space<vmem>>, vector<16x16xf32>
    %cst_37 = arith.constant dense<0.000000e+00> : vector<16x256xf32>
    %86 = tpu.matmul %85, %52, %cst_37 {dimension_numbers = #tpu.dot_dimension_numbers<[1], [0], [0], [1], [0, 0, 1, 1], [], []>} : vector<16x16xf32>, vector<16x256xf32>, vector<16x256xf32> -> vector<16x256xf32>
    %87 = arith.addf %84, %86 : vector<16x256xf32>
    %c0_38 = arith.constant 0 : index
    %c128 = arith.constant 128 : index
    %88 = vector.load %arg3[%c0_38, %c128] : memref<16x144xf32, #tpu.memory_space<vmem>>, vector<16x16xf32>
    %cst_39 = arith.constant dense<0.000000e+00> : vector<16x256xf32>
    %89 = tpu.matmul %88, %81, %cst_39 {dimension_numbers = #tpu.dot_dimension_numbers<[1], [0], [0], [1], [0, 0, 1, 1], [], []>} : vector<16x16xf32>, vector<16x256xf32>, vector<16x256xf32> -> vector<16x256xf32>
    %90 = arith.addf %87, %89 : vector<16x256xf32>
    %cst_40 = arith.constant dense<0.000000e+00> : vector<16xf32>
    %91 = vector.multi_reduction <add>, %90, %cst_40 [1] : vector<16x256xf32> to vector<16xf32>
    %92 = vector.shape_cast %91 : vector<16xf32> to vector<16x1xf32>
    %93 = arith.mulf %90, %90 : vector<16x256xf32>
    %cst_41 = arith.constant dense<0.000000e+00> : vector<16xf32>
    %94 = vector.multi_reduction <add>, %93, %cst_41 [1] : vector<16x256xf32> to vector<16xf32>
    %95 = vector.shape_cast %94 : vector<16xf32> to vector<16x1xf32>
    %cst_42 = arith.constant 3.906250e-03 : f32
    %96 = vector.broadcast %cst_42 : f32 to vector<16x1xf32>
    %97 = arith.mulf %92, %96 : vector<16x1xf32>
    %cst_43 = arith.constant 3.906250e-03 : f32
    %98 = vector.broadcast %cst_43 : f32 to vector<16x1xf32>
    %99 = arith.mulf %95, %98 : vector<16x1xf32>
    %100 = arith.mulf %97, %97 : vector<16x1xf32>
    %101 = arith.subf %99, %100 : vector<16x1xf32>
    %cst_44 = arith.constant 9.99999974E-6 : f32
    %102 = vector.broadcast %cst_44 : f32 to vector<16x1xf32>
    %103 = arith.addf %101, %102 : vector<16x1xf32>
    %104 = math.rsqrt %103 : vector<16x1xf32>
    %105 = arith.mulf %104, %8 : vector<16x1xf32>
    %106 = arith.mulf %97, %105 : vector<16x1xf32>
    %107 = arith.subf %9, %106 : vector<16x1xf32>
    %108 = vector.broadcast %105 : vector<16x1xf32> to vector<16x256xf32>
    %109 = arith.mulf %90, %108 : vector<16x256xf32>
    %110 = vector.broadcast %107 : vector<16x1xf32> to vector<16x256xf32>
    %111 = arith.addf %109, %110 : vector<16x256xf32>
    %112 = math.tanh %111 : vector<16x256xf32>
    %cst_45 = arith.constant dense<0.000000e+00> : vector<16x256xf32>
    %113 = tpu.matmul %4, %112, %cst_45 {dimension_numbers = #tpu.dot_dimension_numbers<[1], [0], [0], [1], [0, 0, 1, 1], [], []>} : vector<16x16xf32>, vector<16x256xf32>, vector<16x256xf32> -> vector<16x256xf32>
    %cst_46 = arith.constant dense<0.000000e+00> : vector<16xf32>
    %114 = vector.multi_reduction <add>, %113, %cst_46 [1] : vector<16x256xf32> to vector<16xf32>
    %115 = vector.shape_cast %114 : vector<16xf32> to vector<16x1xf32>
    %116 = arith.mulf %113, %113 : vector<16x256xf32>
    %cst_47 = arith.constant dense<0.000000e+00> : vector<16xf32>
    %117 = vector.multi_reduction <add>, %116, %cst_47 [1] : vector<16x256xf32> to vector<16xf32>
    %118 = vector.shape_cast %117 : vector<16xf32> to vector<16x1xf32>
    %cst_48 = arith.constant 3.906250e-03 : f32
    %119 = vector.broadcast %cst_48 : f32 to vector<16x1xf32>
    %120 = arith.mulf %115, %119 : vector<16x1xf32>
    %cst_49 = arith.constant 3.906250e-03 : f32
    %121 = vector.broadcast %cst_49 : f32 to vector<16x1xf32>
    %122 = arith.mulf %118, %121 : vector<16x1xf32>
    %123 = arith.mulf %120, %120 : vector<16x1xf32>
    %124 = arith.subf %122, %123 : vector<16x1xf32>
    %cst_50 = arith.constant 9.99999974E-6 : f32
    %125 = vector.broadcast %cst_50 : f32 to vector<16x1xf32>
    %126 = arith.addf %124, %125 : vector<16x1xf32>
    %127 = math.rsqrt %126 : vector<16x1xf32>
    %128 = arith.mulf %127, %10 : vector<16x1xf32>
    %129 = arith.mulf %120, %128 : vector<16x1xf32>
    %130 = arith.subf %11, %129 : vector<16x1xf32>
    %131 = vector.broadcast %128 : vector<16x1xf32> to vector<16x256xf32>
    %132 = arith.mulf %113, %131 : vector<16x256xf32>
    %133 = vector.broadcast %130 : vector<16x1xf32> to vector<16x256xf32>
    %134 = arith.addf %132, %133 : vector<16x256xf32>
    %cst_51 = arith.constant dense<0.000000e+00> : vector<16x256xf32>
    %135 = tpu.matmul %3, %1, %cst_51 {dimension_numbers = #tpu.dot_dimension_numbers<[1], [0], [0], [1], [0, 0, 1, 1], [], []>} : vector<16x8xf32>, vector<8x256xf32>, vector<16x256xf32> -> vector<16x256xf32>
    %cst_52 = arith.constant dense<0.000000e+00> : vector<16xf32>
    %136 = vector.multi_reduction <add>, %135, %cst_52 [1] : vector<16x256xf32> to vector<16xf32>
    %137 = vector.shape_cast %136 : vector<16xf32> to vector<16x1xf32>
    %138 = arith.mulf %135, %135 : vector<16x256xf32>
    %cst_53 = arith.constant dense<0.000000e+00> : vector<16xf32>
    %139 = vector.multi_reduction <add>, %138, %cst_53 [1] : vector<16x256xf32> to vector<16xf32>
    %140 = vector.shape_cast %139 : vector<16xf32> to vector<16x1xf32>
    %cst_54 = arith.constant 3.906250e-03 : f32
    %141 = vector.broadcast %cst_54 : f32 to vector<16x1xf32>
    %142 = arith.mulf %137, %141 : vector<16x1xf32>
    %cst_55 = arith.constant 3.906250e-03 : f32
    %143 = vector.broadcast %cst_55 : f32 to vector<16x1xf32>
    %144 = arith.mulf %140, %143 : vector<16x1xf32>
    %145 = arith.mulf %142, %142 : vector<16x1xf32>
    %146 = arith.subf %144, %145 : vector<16x1xf32>
    %cst_56 = arith.constant 9.99999974E-6 : f32
    %147 = vector.broadcast %cst_56 : f32 to vector<16x1xf32>
    %148 = arith.addf %146, %147 : vector<16x1xf32>
    %149 = math.rsqrt %148 : vector<16x1xf32>
    %150 = arith.mulf %142, %149 : vector<16x1xf32>
    %cst_57 = arith.constant 0.000000e+00 : f32
    %151 = vector.broadcast %cst_57 : f32 to vector<16x1xf32>
    %152 = arith.subf %151, %150 : vector<16x1xf32>
    %153 = vector.broadcast %149 : vector<16x1xf32> to vector<16x256xf32>
    %154 = arith.mulf %135, %153 : vector<16x256xf32>
    %155 = vector.broadcast %152 : vector<16x1xf32> to vector<16x256xf32>
    %156 = arith.addf %154, %155 : vector<16x256xf32>
    %157 = arith.addf %156, %134 : vector<16x256xf32>
    %c0_58 = arith.constant 0 : index
    %c0_59 = arith.constant 0 : index
    %c0_60 = arith.constant 0 : index
    %158 = vector.load %arg4[%c0_58, %c0_59, %c0_60] : memref<1x16x256xf32, #tpu.memory_space<vmem>>, vector<1x16x256xf32>
    %159 = vector.shape_cast %158 : vector<1x16x256xf32> to vector<16x256xf32>
    %160 = vector.shape_cast %157 : vector<16x256xf32> to vector<1x16x256xf32>
    tpu.vector_store %arg4[%c0_58, %c0_59, %c0_60], %160 {strides = array<i32>} : memref<1x16x256xf32, #tpu.memory_space<vmem>>, vector<1x16x256xf32>,
    return
  }
  func.func @transform_0(%arg0: i32) -> (i32, i32, i32) {
    %c0_i32 = arith.constant 0 : i32
    %c0_i32_0 = arith.constant 0 : i32
    %c0_i32_1 = arith.constant 0 : i32
    return %arg0, %c0_i32, %c0_i32_0 : i32, i32, i32
  }
  func.func @transform_1(%arg0: i32) -> (i32, i32) {
    %c0_i32 = arith.constant 0 : i32
    %c0_i32_0 = arith.constant 0 : i32
    %c0_i32_1 = arith.constant 0 : i32
    return %c0_i32, %c0_i32_0 : i32, i32
  }
  func.func @transform_2(%arg0: i32) -> (i32, i32) {
    %c0_i32 = arith.constant 0 : i32
    %c0_i32_0 = arith.constant 0 : i32
    %c0_i32_1 = arith.constant 0 : i32
    return %c0_i32, %c0_i32_0 : i32, i32
  }
  func.func @transform_3(%arg0: i32) -> (i32, i32, i32) {
    %c0_i32 = arith.constant 0 : i32
    %c0_i32_0 = arith.constant 0 : i32
    %c0_i32_1 = arith.constant 0 : i32
    return %arg0, %c0_i32, %c0_i32_0 : i32, i32, i32
  }
}

</mosaic_0001>

<bundles_post_ra>
// kernel: tpu_custom_call.1
= control target key start
LH: loop header
LB: loop body
LE: loop exit
PB: predicated region body
PF: predicated region fallthrough
CT: control target
= control target key end

     0   :  { %8 = vsyncpa [#allocation3], 0  ;;  %s2398_s0 = inlined_call_operand.hbm [shape: f32[1,8,256], index: 0, kind: input, shape index: {}]   ;;  %s2399_s1 = inlined_call_operand.hbm [shape: f32[16,38], index: 1, kind: input, shape index: {}]   ;;  %s2400_s2 = inlined_call_operand.hbm [shape: f32[16,144], index: 2, kind: input, shape index: {}]   ;;  %s2401_s3 = inlined_call_operand.hbm [shape: f32[1,16,256], index: 3, kind: output, shape index: {}]  }
   0x1   :  { %9 = vsyncpa [#allocation6], 0 }
   0x2   :  { %10 = vsyncpa [#allocation4], 0  ;;  %s1881_s12 = smov [#allocation5]   ;;  %s1787_s16 = scalar_lea.hbm %s2399_s1, 256 }
   0x3   :  { %s26_s13 = sshll.u32 %s1881_s12, 4  ;;  %p1788_p0 = scmp.ne.s32.totalorder %s2399_s1, %s1787_s16  ;;  %s27_s13 = int_to_ptr.vmem [resolvable:$true] %s26_s13 }
   0x4   :  { %p1791_p1 = scmp.lt.u32.totalorder %s1787_s16, %s2399_s1 }
   0x6   :  { %p1793_p2 = pnand %p1791_p1, %p1788_p0 }
   0x8   :  { %1796 = shalt.err (!%p1793_p2)
}
   0x9   :  { %s1797_s21 = scalar_lea.vmem %s27_s13, 256  ;;  %p1802_p4 = scmp.lt.s32.totalorder %s27_s13, %s27_s13 }
   0xa   :  { %p1798_p3 = scmp.ne.s32.totalorder %s27_s13, %s1797_s21  ;;  %p1803_p5 = scmp.lt.s32.totalorder %s1797_s21, %s1797_s21 }
   0xc   :  { %p1804_p6 = por %p1803_p5, %p1802_p4 }
   0xe   :  { %p1805_p7 = pnand %p1804_p6, %p1798_p3 }
  0x10   :  { %1808 = shalt.err (!%p1805_p7)
}
  0x11   :  { %s1882_s22 = smov 128   ;;  %s1883_s23 = smov 8  }
  0x12   :  { %32 = dma.hbm_to_vmem [thread:$0]  %s2399_s1, 256, %s27_s13, [#allocation6], %s1882_s22, %s1882_s22, %s1883_s23  }
  0x13   :  { %s1884_s26 = smov [#allocation2]   ;;  %s1885_s28 = smov [#allocation7]  }
  0x14   :  { %s17_s27 = sshll.u32 %s1884_s26, 4  ;;  %s38_s29 = sshll.u32 %s1885_s28, 4  ;;  %s18_s27 = int_to_ptr.vmem [resolvable:$true] %s17_s27  ;;  %s39_s29 = int_to_ptr.vmem [resolvable:$true] %s38_s29 }
  0x15   :  { %s1809_s5 = scalar_lea.hbm %s2398_s0, 256 }
  0x16   :  { %p1810_p8 = scmp.ne.s32.totalorder %s2398_s0, %s1809_s5  ;;  %p1813_p9 = scmp.lt.u32.totalorder %s1809_s5, %s2398_s0 }
  0x18   :  { %p1815_p10 = pnand %p1813_p9, %p1810_p8 }
  0x1a   :  { %1818 = shalt.err (!%p1815_p10)
}
  0x1b   :  { %s1819_s1 = scalar_lea.vmem %s18_s27, 256  ;;  %p1824_p12 = scmp.lt.s32.totalorder %s18_s27, %s18_s27 }
  0x1c   :  { %p1820_p11 = scmp.ne.s32.totalorder %s18_s27, %s1819_s1  ;;  %p1825_p13 = scmp.lt.s32.totalorder %s1819_s1, %s1819_s1 }
  0x1e   :  { %p1826_p0 = por %p1825_p13, %p1824_p12 }
  0x20   :  { %p1827_p1 = pnand %p1826_p0, %p1820_p11 }
  0x22   :  { %1830 = shalt.err (!%p1827_p1)
}
  0x23   :  { %20 = dma.hbm_to_vmem [thread:$0]  %s2398_s0, 256, %s18_s27, [#allocation3]  }
  0x24   :  { %s1831_s14 = scalar_lea.hbm %s2400_s2, 512 }
  0x25   :  { %p1832_p2 = scmp.ne.s32.totalorder %s2400_s2, %s1831_s14  ;;  %p1835_p3 = scmp.lt.u32.totalorder %s1831_s14, %s2400_s2 }
  0x27   :  { %p1837_p4 = pnand %p1835_p3, %p1832_p2 }
  0x29   :  { %1840 = shalt.err (!%p1837_p4)
}
  0x2a   :  { %s1841_s19 = scalar_lea.vmem %s39_s29, 512  ;;  %p1846_p6 = scmp.lt.s32.totalorder %s39_s29, %s39_s29 }
  0x2b   :  { %p1842_p5 = scmp.ne.s32.totalorder %s39_s29, %s1841_s19  ;;  %p1847_p7 = scmp.lt.s32.totalorder %s1841_s19, %s1841_s19 }
  0x2d   :  { %p1848_p8 = por %p1847_p7, %p1846_p6 }
  0x2f   :  { %p1849_p9 = pnand %p1848_p8, %p1842_p5 }
  0x31   :  { %1852 = shalt.err (!%p1849_p9)
}
  0x32   :  { %s1886_s0 = smov 256   ;;  %s1887_s20 = smov 16  }
  0x33   :  { %44 = dma.hbm_to_vmem [thread:$0]  %s2400_s2, 512, %s39_s29, [#allocation6], %s1886_s0, %s1886_s0, %s1887_s20  }
  0x34   :  { %1875 = dma.done.wait [#allocation3], 256  }
  0x35   :  { %1876 = vsyncadd [#allocation3], 4294967040 }
  0x36   :  { %1877 = dma.done.wait [#allocation6], 768  }
  0x37   :  { %1878 = vsyncadd [#allocation6], 4294966528  ;;  %v1888_v0 = vmov 0.0   ;;  %v1966_v1 = vld [vmem:[#allocation2 + $0x8] sm:$0xff]  ;;  %v1968_v2 = vld [vmem:[#allocation2] sm:$0xff]  ;;  %vm60_vm0 = vcmask 64512  }
  0x38   :  { %131 = vmatprep.mubr.f32.mxu0 %v1888_v0  ;;  %665 = vmatprep.mubr.f32.mxu1 %v1888_v0  ;;  %1749 = vtanh.f32 %v1966_v1  ;;  %v1972_v4 = vld [vmem:[#allocation5] sm:$0xff]  ;;  %v1977_v6 = vld [vmem:[#allocation5 + $0x8] sm:$0xff]  ;;  %v1889_v19 = vmov 32   ;;  %v1890_v34 = vmov 33   ;;  %s1891_s2 = smov 1   ;;  %s1892_s23 = smov 112  }
  0x39   :  { %1751 = vtanh.f32 %v1968_v2  ;;  %1659 = vset.pattern.permute.xlu1 %v1889_v19  ;;  %1660 = vset.pattern.permute.xlu0 %v1890_v34  ;;  %s1893_s24 = smov 127   ;;  %s1894_s25 = smov 80   ;;  %vm309_vm12 = vcmask 130048  }
  0x3a   :  { %s1895_s26 = smov 64   ;;  %s1896_s27 = smov 48  }
  0x3b   :  { %s1897_s28 = smov 32   ;;  %s1898_s29 = smov 96  }
  0x3c   :  { %s1901_s30 = smov 120   ;;  %s1904_s4 = smov [#allocation8]  }
  0x3d   :  { %s1526_s5 = sshll.u32 %s1904_s4, 4  ;;  %s1527_s5 = int_to_ptr.vmem [resolvable:$true] %s1526_s5 }
  0x3e   :  { %s1853_s6 = scalar_lea.vmem %s1527_s5, 512  ;;  %p1858_p11 = scmp.lt.s32.totalorder %s1527_s5, %s1527_s5 }
  0x3f   :  { %p1854_p10 = scmp.ne.s32.totalorder %s1527_s5, %s1853_s6  ;;  %p1859_p12 = scmp.lt.s32.totalorder %s1853_s6, %s1853_s6 }
  0x41   :  { %p1860_p13 = por %p1859_p12, %p1858_p11 }
  0x42   :  { %v1750_v3 = vpop.eup %1749 }
  0x43   :  { %v1752_v5 = vpop.eup %1751  ;;  %67 = vmatprep.subr.mxu0 %v1750_v3  ;;  %p1861_p0 = pnand %p1860_p13, %p1854_p10 }
  0x44   :  { %68 = vmatpush1.msra.mxu0 %v1752_v5  ;;  %v2012_v5 = vld [vmem:[#allocation7] sm:$0xff] }
  0x45   :  { %1539 = vmatmul.mubr.msk.f32.vlgmr.msra.gmra.mrb[0].mxu0 %vm60_vm0, %v1972_v4 }
  0x46   :  { %137 = vmatprep.mubr.f32.mxu0 %v1888_v0 }
  0x49   :  { %1540 = vmatmul.mubr.msk.f32.gmra.mrb[2].mxu0 %vm60_vm0, %v1977_v6 }
  0x4a   :  { %378 = vmatprep.mubr.f32.mxu0 %v1888_v0 }
 0x118   :  { %v133_v7 = vpop.f32.mrb[0].mxu0 }
 0x119   :  { %v135_v8 = vpop.f32.mrb[1].mxu0  ;;  %v150_v9 = vmul.f32 %v133_v7, %v133_v7 }
 0x11a   :  { %v144_v10 = vadd.f32 %v135_v8, %v133_v7  ;;  %v151_v11 = vmul.f32 %v135_v8, %v135_v8 }
 0x11c   :  { %145 = vadd.xlane.f32.xlu0 %v144_v10  ;;  %v139_v12 = vpop.f32.mrb[2].mxu0  ;;  %v154_v13 = vadd.f32 %v151_v11, %v150_v9 }
 0x11d   :  { %v141_v14 = vpop.f32.mrb[3].mxu0  ;;  %v152_v15 = vmul.f32 %v139_v12, %v139_v12 }
 0x11e   :  { %155 = vadd.xlane.f32.xlu1 %v154_v13  ;;  %v147_v16 = vadd.f32 %v141_v14, %v139_v12  ;;  %v153_v17 = vmul.f32 %v141_v14, %v141_v14 }
 0x120   :  { %148 = vadd.xlane.f32.xlu0 %v147_v16  ;;  %v157_v18 = vadd.f32 %v153_v17, %v152_v15 }
 0x122   :  { %158 = vadd.xlane.f32.xlu1 %v157_v18 }
 0x1a9   :  { %v146_v20 = vpop.xlane.xlu0 %145 }
 0x1aa   :  { %v160_v21 = vmul.f32 0.00390625, %v146_v20 }
 0x1ab   :  { %v156_v22 = vpop.xlane.xlu1 %155 }
 0x1ac   :  { %v164_v23 = vmul.f32 %v160_v21, %v160_v21  ;;  %v162_v24 = vmul.f32 0.00390625, %v156_v22 }
 0x1ad   :  { %v149_v25 = vpop.xlane.xlu0 %148 }
 0x1ae   :  { %v166_v26 = vsub.f32 %v162_v24, %v164_v23  ;;  %v161_v27 = vmul.f32 0.00390625, %v149_v25 }
 0x1af   :  { %v159_v28 = vpop.xlane.xlu1 %158 }
 0x1b0   :  { %v168_v29 = vadd.f32 1e-05, %v166_v26  ;;  %v165_v30 = vmul.f32 %v161_v27, %v161_v27  ;;  %v163_v31 = vmul.f32 0.00390625, %v159_v28 }
 0x1b2   :  { %1753 = vrsqrt.f32 %v168_v29  ;;  %v167_v32 = vsub.f32 %v163_v31, %v165_v30 }
 0x1b4   :  { %v169_v33 = vadd.f32 1e-05, %v167_v32 }
 0x1b6   :  { %1755 = vrsqrt.f32 %v169_v33 }
 0x1bc   :  { %v1754_v35 = vpop.eup %1753 }
 0x1bd   :  { %v172_v36 = vmul.f32 %v1754_v35, %v1972_v4 }
 0x1bf   :  { %v174_v37 = vmul.f32 %v172_v36, %v160_v21 }
 0x1c0   :  { %v1756_v38 = vpop.eup %1755 }
 0x1c1   :  { %178 = vrot.lane.b32.xlu0 %v174_v37, %s1891_s2  ;;  %v173_v39 = vmul.f32 %v1756_v38, %v1977_v6 }
 0x1c3   :  { %v175_v40 = vmul.f32 %v173_v39, %v161_v27 }
 0x1c5   :  { %180 = vrot.lane.b32.xlu1 %v175_v40, %s1891_s2 }
 0x1c9   :  { %188 = vperm.xlu1 %1659, %v172_v36  }
 0x1cd   :  { %193 = vperm.xlu1 %1659, %v173_v39  }
 0x1d1   :  { %1661 = vset.pattern.permute.xlu1 %v1890_v34 }
 0x233   :  { %v179_v41 = vpop.permute.xlu0 %178 }
 0x234   :  { %v184_v42 = vsub.f32 %v1972_v4, %v179_v41 }
 0x236   :  { %202 = vperm.xlu0 %1660, %v184_v42  }
 0x237   :  { %v181_v43 = vpop.permute.xlu1 %180 }
 0x238   :  { %v185_v44 = vsub.f32 %v1977_v6, %v181_v43 }
 0x23a   :  { %207 = vperm.xlu1 %1661, %v185_v44  }
 0x248   :  { %v189_v45 = vpop.permute.xlu1 %188 }
 0x249   :  { %v196_v46 = vmul.f32 %v189_v45, %v133_v7  ;;  %v197_v47 = vmul.f32 %v189_v45, %v135_v8  ;;  %v2014_v7 = vld [vmem:[#allocation7 + $0x10] sm:$0xff]  ;;  %v218_v8 = vlaneseq }
 0x24b   :  { %v2026_v9 = vand.u32 127, %v218_v8 }
 0x24c   :  { %v194_v48 = vpop.permute.xlu1 %193 }
 0x24d   :  { %v198_v52 = vmul.f32 %v194_v48, %v139_v12  ;;  %v199_v53 = vmul.f32 %v194_v48, %v141_v14  ;;  %v2029_v10 = vadd.s32 128, %v2026_v9  ;;  %v223_v12 = vshra.s32 %v2026_v9, 4 }
 0x24e   :  { %vm241_vm1 = vcmp.lt.s32.totalorder %v2026_v9, 16  ;;  %vm254_vm2 = vcmp.lt.s32.totalorder %v2026_v9, 112  ;;  %vm275_vm7 = vcmp.lt.s32.totalorder %v2026_v9, 1  ;;  %vm288_vm8 = vcmp.lt.s32.totalorder %v2026_v9, 127 }
 0x24f   :  { %v224_v13 = vshra.s32 %v2029_v10, 4  ;;  %vm2035_vm3 = vcmp.eq.s32.totalorder %v223_v12, 0  ;;  %vm2039_vm4 = vcmp.eq.s32.totalorder %v223_v12, 15  ;;  %v222_v27 = vand.u32 15, %v2029_v10 }
 0x250   :  { %v221_v30 = vand.u32 15, %v2026_v9 }
 0x251   :  { %vm2043_vm5 = vcmp.eq.s32.totalorder %v224_v13, 15  ;;  %vm2047_vm6 = vcmp.eq.s32.totalorder %v224_v13, 0  ;;  %vm2099_vm9 = vcmp.eq.s32.totalorder %v222_v27, 0  ;;  %vm2137_vm11 = vcmp.eq.s32.totalorder %v222_v27, 15 }
 0x252   :  { %vm2106_vm10 = vcmp.eq.s32.totalorder %v221_v30, 0  ;;  %vm2157_vm13 = vcmp.eq.s32.totalorder %v221_v30, 15 }
 0x2b5   :  { %v203_v49 = vpop.permute.xlu0 %202 }
 0x2b6   :  { %v210_v50 = vadd.f32 %v203_v49, %v196_v46  ;;  %v211_v51 = vadd.f32 %v203_v49, %v197_v47 }
 0x2b8   :  { %1757 = vtanh.f32 %v210_v50 }
 0x2b9   :  { %v208_v54 = vpop.permute.xlu1 %207  ;;  %1759 = vtanh.f32 %v211_v51 }
 0x2ba   :  { %v212_v55 = vadd.f32 %v208_v54, %v198_v52  ;;  %v213_v56 = vadd.f32 %v208_v54, %v199_v53 }
 0x2bc   :  { %1761 = vtanh.f32 %v212_v55 }
 0x2bd   :  { %1763 = vtanh.f32 %v213_v56 }
 0x2c2   :  { %v1988_v57 = vpop.eup %1757 }
 0x2c3   :  { %v1990_v58 = vpop.eup %1759 }
 0x2c6   :  { %v1992_v59 = vpop.eup %1761 }
 0x2c7   :  { %v1994_v60 = vpop.eup %1763  ;;  %v1662_v61 = vpack.i.bf16 %v1992_v59, %v1988_v57  ;;  %v1581_v3 = vpack.c.bf16 %v1992_v59, %v1988_v57 }
 0x2c8   :  { %v1667_v62 = vpack.i.bf16 %v1994_v60, %v1990_v58  ;;  %v1579_v63 = vpack.c.bf16 %v1994_v60, %v1990_v58 }
 0x2c9   :  { %1663 = vrot.lane.b32.xlu1 %v1662_v61, %s1887_s20 }
 0x2ca   :  { %1668 = vrot.lane.b32.xlu0 %v1667_v62, %s1887_s20 }
 0x2cd   :  { %1673 = vrot.lane.b32.xlu1 %v1662_v61, %s1892_s23 }
 0x2ce   :  { %1678 = vrot.lane.b32.xlu0 %v1667_v62, %s1892_s23 }
 0x2d1   :  { %1683 = vrot.lane.b32.xlu1 %v1662_v61, %s1891_s2 }
 0x2d2   :  { %1688 = vrot.lane.b32.xlu0 %v1667_v62, %s1891_s2 }
 0x2d5   :  { %1693 = vrot.lane.b32.xlu1 %v1662_v61, %s1893_s24 }
 0x2d6   :  { %1698 = vrot.lane.b32.xlu0 %v1667_v62, %s1893_s24 }
 0x2d9   :  { %593 = vrot.lane.b32.xlu1 %v2012_v5, %s1894_s25 }
 0x2da   :  { %595 = vrot.lane.b32.xlu0 %v2014_v7, %s1894_s25 }
 0x2dd   :  { %682 = vrot.lane.b32.xlu1 %v2012_v5, %s1895_s26 }
 0x2de   :  { %684 = vrot.lane.b32.xlu0 %v2014_v7, %s1895_s26 }
 0x2e1   :  { %771 = vrot.lane.b32.xlu1 %v2012_v5, %s1896_s27 }
 0x2e2   :  { %773 = vrot.lane.b32.xlu0 %v2014_v7, %s1896_s27 }
 0x2e5   :  { %305 = vrot.lane.b32.xlu1 %v2012_v5, %s1892_s23 }
 0x2e6   :  { %892 = vrot.lane.b32.xlu0 %v2012_v5, %s1897_s28 }
 0x33b   :  { %v1664_v11 = vpop.permute.xlu1 %1663 }
 0x33c   :  { %v1669_v14 = vpop.permute.xlu0 %1668  ;;  %v1666_v17 = vunpack.i.h.bf16 %v1664_v11  ;;  %v1665_v18 = vunpack.i.l.bf16 %v1664_v11 }
 0x33d   :  { %v1671_v15 = vunpack.i.h.bf16 %v1669_v14  ;;  %v1670_v16 = vunpack.i.l.bf16 %v1669_v14 }
 0x33f   :  { %v1674_v20 = vpop.permute.xlu1 %1673  ;;  %v243_v31 = vsel %vm241_vm1, %v1666_v17, %v1671_v15  ;;  %v245_v32 = vsel %vm241_vm1, %v1671_v15, %v1666_v17  ;;  %v242_v33 = vsel %vm241_vm1, %v1665_v18, %v1670_v16  ;;  %v244_v34 = vsel %vm241_vm1, %v1670_v16, %v1665_v18 }
 0x340   :  { %v1679_v24 = vpop.permute.xlu0 %1678  ;;  %v1676_v25 = vunpack.i.h.bf16 %v1674_v20  ;;  %v1675_v26 = vunpack.i.l.bf16 %v1674_v20 }
 0x341   :  { %v1681_v28 = vunpack.i.h.bf16 %v1679_v24  ;;  %v1680_v29 = vunpack.i.l.bf16 %v1679_v24 }
 0x343   :  { %v256_v35 = vsel %vm254_vm2, %v1676_v25, %v1681_v28  ;;  %v258_v36 = vsel %vm254_vm2, %v1681_v28, %v1676_v25  ;;  %v255_v37 = vsel %vm254_vm2, %v1675_v26, %v1680_v29  ;;  %v257_v38 = vsel %vm254_vm2, %v1680_v29, %v1675_v26  ;;  %v1684_v39 = vpop.permute.xlu1 %1683 }
 0x344   :  { %v259_v40 = vsel %vm2035_vm3, %v255_v37, %v244_v34  ;;  %v261_v41 = vsel %vm2035_vm3, %v256_v35, %v245_v32  ;;  %v1689_v42 = vpop.permute.xlu0 %1688  ;;  %v1686_v43 = vunpack.i.h.bf16 %v1684_v39  ;;  %v1685_v44 = vunpack.i.l.bf16 %v1684_v39 }
 0x345   :  { %v1691_v45 = vunpack.i.h.bf16 %v1689_v42  ;;  %v1690_v46 = vunpack.i.l.bf16 %v1689_v42  ;;  %v2077_v47 = vsel %vm2039_vm4, %v244_v34, %v255_v37  ;;  %v2081_v48 = vsel %vm2039_vm4, %v245_v32, %v256_v35 }
 0x346   :  { %v1702_v49 = vpack.i.bf16 %v2081_v48, %v2077_v47  ;;  %v2087_v50 = vsel %vm2043_vm5, %v242_v33, %v257_v38  ;;  %v2091_v51 = vsel %vm2043_vm5, %v243_v31, %v258_v36  ;;  %v260_v52 = vsel %vm2047_vm6, %v257_v38, %v242_v33 }
 0x347   :  { %v1707_v53 = vpack.i.bf16 %v2091_v51, %v2087_v50  ;;  %v262_v54 = vsel %vm2047_vm6, %v258_v36, %v243_v31  ;;  %v1694_v55 = vpop.permute.xlu1 %1693  ;;  %v1565_v56 = vpack.c.bf16 %v261_v41, %v259_v40  ;;  %v569_v15 = vsel %vm275_vm7, %v1685_v44, %v1690_v46 }
 0x348   :  { %1703 = vrot.lane.b32.xlu0 %v1702_v49, %s1891_s2  ;;  %v1563_v62 = vpack.c.bf16 %v262_v54, %v260_v52  ;;  %v1699_v8 = vpop.permute.xlu0 %1698  ;;  %v1696_v10 = vunpack.i.h.bf16 %v1694_v55  ;;  %v1695_v11 = vunpack.i.l.bf16 %v1694_v55  ;;  %v570_v16 = vsel %vm275_vm7, %v1686_v43, %v1691_v45 }
 0x349   :  { %1708 = vrot.lane.b32.xlu1 %v1707_v53, %s1891_s2  ;;  %v1701_v13 = vunpack.i.h.bf16 %v1699_v8  ;;  %v1700_v14 = vunpack.i.l.bf16 %v1699_v8  ;;  %v571_v17 = vsel %vm275_vm7, %v1690_v46, %v1685_v44  ;;  %v572_v18 = vsel %vm275_vm7, %v1691_v45, %v1686_v43 }
 0x34a   :  { %1564 = vmatprep.subr.bf16.mxu0 %v1563_v62  ;;  %v1727_v33 = vpack.i.bf16 %v262_v54, %v260_v52  ;;  %v1722_v34 = vpack.i.bf16 %v261_v41, %v259_v40  ;;  %v1591_v36 = vpack.c.bf16 %v2091_v51, %v2087_v50  ;;  %v1593_v37 = vpack.c.bf16 %v2081_v48, %v2077_v47 }
 0x34b   :  { %1566 = vmatpush1.bf16.msra.mxu0 %v1565_v56  ;;  %v583_v19 = vsel %vm288_vm8, %v1700_v14, %v1695_v11  ;;  %v584_v20 = vsel %vm288_vm8, %v1701_v13, %v1696_v10  ;;  %v581_v21 = vsel %vm288_vm8, %v1695_v11, %v1700_v14  ;;  %v582_v22 = vsel %vm288_vm8, %v1696_v10, %v1701_v13  ;;  %v594_v23 = vpop.permute.xlu1 %593 }
 0x34c   :  { %1713 = vrot.lane.b32.xlu0 %v1702_v49, %s1893_s24  ;;  %v586_v24 = vsel %vm2099_vm9, %v583_v19, %v569_v15  ;;  %v588_v25 = vsel %vm2099_vm9, %v584_v20, %v570_v16  ;;  %v585_v26 = vsel %vm2106_vm10, %v581_v21, %v571_v17  ;;  %v587_v28 = vsel %vm2106_vm10, %v582_v22, %v572_v18  ;;  %v596_v42 = vpop.permute.xlu0 %595 }
 0x34d   :  { %1718 = vrot.lane.b32.xlu1 %v1707_v53, %s1893_s24  ;;  %v1575_v29 = vpack.c.bf16 %v588_v25, %v586_v24  ;;  %v1577_v31 = vpack.c.bf16 %v587_v28, %v585_v26  ;;  %v590_v27 = vsel %vm2137_vm11, %v569_v15, %v583_v19  ;;  %v592_v38 = vsel %vm2137_vm11, %v570_v16, %v584_v20 }
 0x34e   :  { %v1583_v39 = vpack.c.bf16 %v592_v38, %v590_v27  ;;  %v589_v58 = vsel %vm2157_vm13, %v571_v17, %v581_v21  ;;  %v591_v60 = vsel %vm2157_vm13, %v572_v18, %v582_v22 }
 0x34f   :  { %1576 = vmatprep.subr.bf16.mxu1 %v1575_v29  ;;  %v683_v35 = vpop.permute.xlu1 %682  ;;  %v1585_v57 = vpack.c.bf16 %v591_v60, %v589_v58 }
 0x350   :  { %1728 = vrot.lane.b32.xlu0 %v1727_v33, %s1891_s2  ;;  %1578 = vmatpush1.bf16.msra.mxu1 %v1577_v31  ;;  %v685_v59 = vpop.permute.xlu0 %684 }
 0x351   :  { %1723 = vrot.lane.b32.xlu1 %v1722_v34, %s1891_s2  ;;  %1580 = vmatprep.subr.bf16.mxu1 %v1579_v63 }
 0x353   :  { %1547 = vmatmul.mubr.msk.f32.vlgmr.msra.gmra.mrb[0].mxu1 %vm309_vm12, %v594_v23  ;;  %v772_v40 = vpop.permute.xlu1 %771 }
 0x354   :  { %1738 = vrot.lane.b32.xlu0 %v1727_v33, %s1893_s24  ;;  %1582 = vmatpush1.bf16.msra.mxu1 %v1581_v3  ;;  %v774_v3 = vpop.permute.xlu0 %773 }
 0x355   :  { %1733 = vrot.lane.b32.xlu1 %v1722_v34, %s1893_s24  ;;  %1584 = vmatprep.subr.bf16.mxu1 %v1583_v39 }
 0x356   :  { %671 = vmatprep.mubr.f32.mxu1 %v1888_v0 }
 0x357   :  { %1548 = vmatmul.mubr.msk.f32.gmra.mrb[2].mxu1 %vm309_vm12, %v596_v42  ;;  %v306_v63 = vpop.permute.xlu1 %305 }
 0x358   :  { %894 = vrot.lane.b32.xlu0 %v2014_v7, %s1897_s28  ;;  %754 = vmatprep.mubr.f32.mxu1 %v1888_v0  ;;  %v893_v30 = vpop.permute.xlu0 %892 }
 0x359   :  { %307 = vrot.lane.b32.xlu1 %v2014_v7, %s1892_s23  ;;  %1541 = vmatmul.mubr.msk.f32.vlgmr.msra.gmra.mrb[4].mxu0 %vm309_vm12, %v306_v63 }
 0x35a   :  { %384 = vmatprep.mubr.f32.mxu0 %v1888_v0 }
 0x35b   :  { %1549 = vmatmul.mubr.msk.f32.vlgmr.msra.gmra.mrb[0].mxu1 %vm309_vm12, %v683_v35 }
 0x35c   :  { %1586 = vmatpush1.bf16.msra.mxu1 %v1585_v57  ;;  %983 = vrot.lane.b32.xlu0 %v2014_v7, %s1887_s20 }
 0x35d   :  { %981 = vrot.lane.b32.xlu1 %v2012_v5, %s1887_s20  ;;  %760 = vmatprep.mubr.f32.mxu1 %v1888_v0 }
 0x35f   :  { %1550 = vmatmul.mubr.msk.f32.gmra.mrb[2].mxu1 %vm309_vm12, %v685_v59 }
 0x360   :  { %474 = vrot.lane.b32.xlu0 %v2014_v7, %s1898_s29  ;;  %843 = vmatprep.mubr.f32.mxu1 %v1888_v0 }
 0x361   :  { %472 = vrot.lane.b32.xlu1 %v2012_v5, %s1898_s29 }
 0x363   :  { %1551 = vmatmul.mubr.msk.f32.vlgmr.msra.gmra.mrb[0].mxu1 %vm309_vm12, %v772_v40 }
 0x364   :  { %849 = vmatprep.mubr.f32.mxu1 %v1888_v0 }
 0x367   :  { %1552 = vmatmul.mubr.msk.f32.gmra.mrb[2].mxu1 %vm309_vm12, %v774_v3 }
 0x368   :  { %964 = vmatprep.mubr.f32.mxu1 %v1888_v0 }
 0x3ba   :  { %v1704_v43 = vpop.permute.xlu0 %1703 }
 0x3bb   :  { %v1709_v44 = vpop.permute.xlu1 %1708  ;;  %v1706_v45 = vunpack.i.h.bf16 %v1704_v43  ;;  %v1705_v46 = vunpack.i.l.bf16 %v1704_v43 }
 0x3bc   :  { %v1711_v49 = vunpack.i.h.bf16 %v1709_v44  ;;  %v1710_v52 = vunpack.i.l.bf16 %v1709_v44 }
 0x3be   :  { %v1714_v53 = vpop.permute.xlu0 %1713  ;;  %v869_v10 = vsel %vm275_vm7, %v1706_v45, %v1711_v49  ;;  %v868_v11 = vsel %vm275_vm7, %v1705_v46, %v1710_v52  ;;  %v2211_v18 = vsel %vm275_vm7, %v1711_v49, %v1706_v45  ;;  %v870_v19 = vsel %vm275_vm7, %v1710_v52, %v1705_v46 }
 0x3bf   :  { %v1716_v54 = vunpack.i.h.bf16 %v1714_v53  ;;  %v1715_v55 = vunpack.i.l.bf16 %v1714_v53  ;;  %v1719_v56 = vpop.permute.xlu1 %1718 }
 0x3c0   :  { %v1721_v62 = vunpack.i.h.bf16 %v1719_v56  ;;  %v1720_v8 = vunpack.i.l.bf16 %v1719_v56 }
 0x3c2   :  { %v2199_v13 = vsel %vm288_vm8, %v1716_v54, %v1721_v62  ;;  %v883_v14 = vsel %vm288_vm8, %v1721_v62, %v1716_v54  ;;  %v2205_v15 = vsel %vm288_vm8, %v1715_v55, %v1720_v8  ;;  %v882_v16 = vsel %vm288_vm8, %v1720_v8, %v1715_v55  ;;  %v1729_v17 = vpop.permute.xlu0 %1728 }
 0x3c3   :  { %v1724_v20 = vpop.permute.xlu1 %1723  ;;  %v885_v21 = vsel %vm2099_vm9, %v882_v16, %v868_v11  ;;  %v887_v22 = vsel %vm2099_vm9, %v883_v14, %v869_v10  ;;  %v1731_v24 = vunpack.i.h.bf16 %v1729_v17  ;;  %v884_v26 = vsel %vm2106_vm10, %v2205_v15, %v870_v19 }
 0x3c4   :  { %v1726_v23 = vunpack.i.h.bf16 %v1724_v20  ;;  %v1587_v25 = vpack.c.bf16 %v887_v22, %v885_v21  ;;  %v1725_v28 = vunpack.i.l.bf16 %v1724_v20  ;;  %v1730_v29 = vunpack.i.l.bf16 %v1729_v17 }
 0x3c5   :  { %v886_v31 = vsel %vm2106_vm10, %v2199_v13, %v2211_v18  ;;  %v889_v34 = vsel %vm2137_vm11, %v868_v11, %v882_v16  ;;  %v891_v35 = vsel %vm2137_vm11, %v869_v10, %v883_v14  ;;  %v888_v47 = vsel %vm2157_vm13, %v870_v19, %v2205_v15  ;;  %v1071_v11 = vld [vmem:[#allocation7 + $0x18] sm:$0xff] }
 0x3c6   :  { %1588 = vmatprep.subr.bf16.mxu1 %v1587_v25  ;;  %v1739_v33 = vpop.permute.xlu0 %1738  ;;  %v1589_v40 = vpack.c.bf16 %v886_v31, %v884_v26  ;;  %v277_v42 = vsel %vm275_vm7, %v1726_v23, %v1731_v24  ;;  %v279_v63 = vsel %vm275_vm7, %v1731_v24, %v1726_v23  ;;  %v276_v57 = vsel %vm275_vm7, %v1725_v28, %v1730_v29 }
 0x3c7   :  { %v1734_v27 = vpop.permute.xlu1 %1733  ;;  %v1741_v38 = vunpack.i.h.bf16 %v1739_v33  ;;  %v1740_v39 = vunpack.i.l.bf16 %v1739_v33  ;;  %v278_v59 = vsel %vm275_vm7, %v1730_v29, %v1725_v28  ;;  %v1595_v3 = vpack.c.bf16 %v891_v35, %v889_v34 }
 0x3c8   :  { %v1736_v58 = vunpack.i.h.bf16 %v1734_v27  ;;  %v1735_v60 = vunpack.i.l.bf16 %v1734_v27  ;;  %1590 = vmatpush1.bf16.msra.mxu1 %v1589_v40  ;;  %v890_v48 = vsel %vm2157_vm13, %v2211_v18, %v2199_v13  ;;  %v1899_v35 = vmov 34  }
 0x3c9   :  { %1592 = vmatprep.subr.bf16.mxu1 %v1591_v36  ;;  %v1597_v62 = vpack.c.bf16 %v890_v48, %v888_v47  ;;  %1742 = vset.pattern.permute.xlu1 %v1899_v35 }
 0x3ca   :  { %v290_v43 = vsel %vm288_vm8, %v1736_v58, %v1741_v38  ;;  %v292_v44 = vsel %vm288_vm8, %v1741_v38, %v1736_v58  ;;  %v289_v45 = vsel %vm288_vm8, %v1735_v60, %v1740_v39  ;;  %v291_v46 = vsel %vm288_vm8, %v1740_v39, %v1735_v60  ;;  %v895_v61 = vpop.permute.xlu0 %894 }
 0x3cb   :  { %v308_v49 = vpop.permute.xlu1 %307  ;;  %v294_v52 = vsel %vm2099_vm9, %v291_v46, %v276_v57  ;;  %v296_v53 = vsel %vm2099_vm9, %v292_v44, %v277_v42  ;;  %v293_v54 = vsel %vm2106_vm10, %v289_v45, %v278_v59  ;;  %v295_v55 = vsel %vm2106_vm10, %v290_v43, %v279_v63  ;;  %1553 = vmatmul.mubr.msk.f32.vlgmr.msra.gmra.mrb[0].mxu1 %vm309_vm12, %v893_v30 }
 0x3cc   :  { %1542 = vmatmul.mubr.msk.f32.gmra.mrb[6].mxu0 %vm309_vm12, %v308_v49  ;;  %v1567_v9 = vpack.c.bf16 %v296_v53, %v294_v52  ;;  %v1569_v50 = vpack.c.bf16 %v295_v55, %v293_v54  ;;  %v298_v51 = vsel %vm2137_vm11, %v276_v57, %v291_v46  ;;  %1594 = vmatpush1.bf16.msra.mxu1 %v1593_v37 }
 0x3cd   :  { %970 = vmatprep.mubr.f32.mxu1 %v1888_v0  ;;  %v300_v12 = vsel %vm2137_vm11, %v277_v42, %v292_v44  ;;  %1596 = vmatprep.subr.bf16.mxu1 %v1595_v3  ;;  %v297_v30 = vsel %vm2157_vm13, %v278_v59, %v289_v45  ;;  %v299_v56 = vsel %vm2157_vm13, %v279_v63, %v290_v43  ;;  %v1900_v44 = vmov 35  }
 0x3ce   :  { %1568 = vmatprep.subr.bf16.mxu0 %v1567_v9  ;;  %v1571_v36 = vpack.c.bf16 %v300_v12, %v298_v51  ;;  %459 = vmatprep.mubr.f32.mxu0 %v1888_v0  ;;  %v1573_v37 = vpack.c.bf16 %v299_v56, %v297_v30  ;;  %v984_v8 = vpop.permute.xlu0 %983 }
 0x3cf   :  { %1570 = vmatpush1.bf16.msra.mxu0 %v1569_v50  ;;  %1554 = vmatmul.mubr.msk.f32.gmra.mrb[2].mxu1 %vm309_vm12, %v895_v61  ;;  %v982_v32 = vpop.permute.xlu1 %981 }
 0x3d0   :  { %1572 = vmatprep.subr.bf16.mxu0 %v1571_v36  ;;  %1053 = vmatprep.mubr.f32.mxu1 %v1888_v0 }
 0x3d1   :  { %1744 = vset.pattern.permute.xlu0 %v1900_v44 }
 0x3d2   :  { %1543 = vmatmul.mubr.msk.f32.vlgmr.msra.gmra.mrb[4].mxu0 %vm309_vm12, %v2012_v5  ;;  %v1070_v5 = vld [vmem:[#allocation7 + $0x8] sm:$0xff]  ;;  %v475_v10 = vpop.permute.xlu0 %474 }
 0x3d3   :  { %1574 = vmatpush1.bf16.msra.mxu0 %v1573_v37  ;;  %465 = vmatprep.mubr.f32.mxu0 %v1888_v0  ;;  %v473_v41 = vpop.permute.xlu1 %472 }
 0x3d4   :  { %1555 = vmatmul.mubr.msk.f32.vlgmr.msra.gmra.mrb[0].mxu1 %vm309_vm12, %v982_v32 }
 0x3d5   :  { %1598 = vmatpush1.bf16.msra.mxu1 %v1597_v62  ;;  %1059 = vmatprep.mubr.f32.mxu1 %v1888_v0 }
 0x3d6   :  { %1544 = vmatmul.mubr.msk.f32.gmra.mrb[6].mxu0 %vm309_vm12, %v2014_v7 }
 0x3d7   :  { %544 = vmatprep.mubr.f32.mxu0 %v1888_v0 }
 0x3d8   :  { %1556 = vmatmul.mubr.msk.f32.gmra.mrb[2].mxu1 %vm309_vm12, %v984_v8 }
 0x3d9   :  { %1142 = vmatprep.mubr.f32.mxu1 %v1888_v0 }
 0x3da   :  { %1545 = vmatmul.mubr.msk.f32.vlgmr.msra.gmra.mrb[4].mxu0 %vm309_vm12, %v473_v41 }
 0x3db   :  { %550 = vmatprep.mubr.f32.mxu0 %v1888_v0 }
 0x3dc   :  { %1557 = vmatmul.mubr.msk.f32.vlgmr.msra.gmra.mrb[0].mxu1 %vm309_vm12, %v1070_v5 }
 0x3dd   :  { %1148 = vmatprep.mubr.f32.mxu1 %v1888_v0 }
 0x3de   :  { %1546 = vmatmul.mubr.msk.f32.gmra.mrb[6].mxu0 %vm309_vm12, %v475_v10 }
 0x3df   :  { %1305 = vmatprep.mubr.f32.mxu0 %v1888_v0 }
 0x3e0   :  { %1558 = vmatmul.mubr.msk.f32.gmra.mrb[2].mxu1 %vm309_vm12, %v1071_v11 }
 0x4ad   :  { %v546_v7 = vpop.f32.mrb[4].mxu0 }
 0x4ae   :  { %v548_v13 = vpop.f32.mrb[5].mxu0 }
 0x4af   :  { %v1144_v14 = vpop.f32.mrb[0].mxu1 }
 0x4b0   :  { %v2298_v15 = vadd.f32 %v1144_v14, %v546_v7  ;;  %v1146_v16 = vpop.f32.mrb[1].mxu1 }
 0x4b1   :  { %v2300_v17 = vadd.f32 %v1146_v16, %v548_v13  ;;  %v552_v18 = vpop.f32.mrb[6].mxu0 }
 0x4b2   :  { %v554_v19 = vpop.f32.mrb[7].mxu0  ;;  %v1165_v20 = vmul.f32 %v2298_v15, %v2298_v15 }
 0x4b3   :  { %v1150_v21 = vpop.f32.mrb[2].mxu1  ;;  %v1159_v22 = vadd.f32 %v2300_v17, %v2298_v15  ;;  %v1166_v23 = vmul.f32 %v2300_v17, %v2300_v17 }
 0x4b4   :  { %v1605_v24 = vadd.f32 %v1150_v21, %v552_v18  ;;  %v1152_v25 = vpop.f32.mrb[3].mxu1 }
 0x4b5   :  { %v1606_v26 = vadd.f32 %v1152_v25, %v554_v19  ;;  %1160 = vadd.xlane.f32.xlu1 %v1159_v22  ;;  %v1169_v28 = vadd.f32 %v1166_v23, %v1165_v20 }
 0x4b6   :  { %v1167_v31 = vmul.f32 %v1605_v24, %v1605_v24 }
 0x4b7   :  { %1170 = vadd.xlane.f32.xlu0 %v1169_v28  ;;  %v1162_v29 = vadd.f32 %v1606_v26, %v1605_v24  ;;  %v1168_v33 = vmul.f32 %v1606_v26, %v1606_v26 }
 0x4b9   :  { %v1172_v34 = vadd.f32 %v1168_v33, %v1167_v31 }
 0x4bb   :  { %1163 = vadd.xlane.f32.xlu0 %v1162_v29 }
 0x4bf   :  { %1173 = vadd.xlane.f32.xlu0 %v1172_v34 }
 0x542   :  { %v1161_v27 = vpop.xlane.xlu1 %1160 }
 0x543   :  { %v1175_v38 = vmul.f32 0.00390625, %v1161_v27 }
 0x544   :  { %v1171_v39 = vpop.xlane.xlu0 %1170 }
 0x545   :  { %v1179_v40 = vmul.f32 %v1175_v38, %v1175_v38  ;;  %v1177_v42 = vmul.f32 0.00390625, %v1171_v39 }
 0x547   :  { %v1181_v58 = vsub.f32 %v1177_v42, %v1179_v40 }
 0x548   :  { %v1164_v60 = vpop.xlane.xlu0 %1163 }
 0x549   :  { %v1183_v63 = vadd.f32 1e-05, %v1181_v58  ;;  %v1176_v57 = vmul.f32 0.00390625, %v1164_v60 }
 0x54b   :  { %1765 = vrsqrt.f32 %v1183_v63  ;;  %v1180_v3 = vmul.f32 %v1176_v57, %v1176_v57 }
 0x54c   :  { %v1174_v59 = vpop.xlane.xlu0 %1173 }
 0x54d   :  { %v1178_v43 = vmul.f32 0.00390625, %v1174_v59  ;;  %v1902_v59 = vmov 36  }
 0x54f   :  { %v1182_v45 = vsub.f32 %v1178_v43, %v1180_v3 }
 0x551   :  { %v1184_v46 = vadd.f32 1e-05, %v1182_v45 }
 0x553   :  { %1767 = vrsqrt.f32 %v1184_v46 }
 0x555   :  { %v1766_v49 = vpop.eup %1765 }
 0x556   :  { %v1187_v52 = vmul.f32 %v1766_v49, %v1972_v4 }
 0x558   :  { %v1189_v53 = vmul.f32 %v1187_v52, %v1175_v38 }
 0x55a   :  { %1193 = vrot.lane.b32.xlu1 %v1189_v53, %s1891_s2 }
 0x55d   :  { %v1768_v54 = vpop.eup %1767 }
 0x55e   :  { %1203 = vperm.xlu1 %1742, %v1187_v52   ;;  %v1188_v55 = vmul.f32 %v1768_v54, %v1977_v6 }
 0x560   :  { %v1190_v9 = vmul.f32 %v1188_v55, %v1176_v57 }
 0x562   :  { %1208 = vperm.xlu1 %1742, %v1188_v55   ;;  %1195 = vrot.lane.b32.xlu0 %v1190_v9, %s1891_s2 }
 0x566   :  { %1743 = vset.pattern.permute.xlu1 %v1900_v44 }
 0x5cc   :  { %v1194_v50 = vpop.permute.xlu1 %1193 }
 0x5cd   :  { %v1199_v51 = vsub.f32 %v1972_v4, %v1194_v50 }
 0x5cf   :  { %1217 = vperm.xlu1 %1743, %v1199_v51  }
 0x5d3   :  { %1233 = vrot.lane.b32.xlu1 %v1972_v4, %s1892_s23 }
 0x5d4   :  { %v1196_v61 = vpop.permute.xlu0 %1195  ;;  %1746 = vset.pattern.permute.xlu1 %v1902_v59 }
 0x5d5   :  { %v1200_v12 = vsub.f32 %v1977_v6, %v1196_v61 }
 0x5d7   :  { %1222 = vperm.xlu0 %1744, %v1200_v12   ;;  %1235 = vrot.lane.b32.xlu1 %v1977_v6, %s1892_s23 }
 0x5db   :  { %1388 = vrot.lane.b32.xlu0 %v1972_v4, %s1901_s30  ;;  %1390 = vrot.lane.b32.xlu1 %v1977_v6, %s1901_s30 }
 0x5dc   :  { %1745 = vset.pattern.permute.xlu0 %v1902_v59 }
 0x5dd   :  { %v1204_v36 = vpop.permute.xlu1 %1203 }
 0x5de   :  { %v1211_v47 = vmul.f32 %v2298_v15, %v1204_v36  ;;  %v1212_v48 = vmul.f32 %v2300_v17, %v1204_v36 }
 0x5e1   :  { %v1209_v30 = vpop.permute.xlu1 %1208 }
 0x5e2   :  { %v1213_v62 = vmul.f32 %v1605_v24, %v1209_v30  ;;  %v1214_v8 = vmul.f32 %v1606_v26, %v1209_v30 }
 0x64e   :  { %v1218_v56 = vpop.permute.xlu1 %1217 }
 0x64f   :  { %v1225_v32 = vadd.f32 %v1218_v56, %v1211_v47  ;;  %v1226_v37 = vadd.f32 %v1218_v56, %v1212_v48 }
 0x651   :  { %1769 = vtanh.f32 %v1225_v32  ;;  %v1903_v32 = vmov 37  }
 0x652   :  { %1771 = vtanh.f32 %v1226_v37  ;;  %v1234_v15 = vpop.permute.xlu1 %1233 }
 0x656   :  { %v1223_v41 = vpop.permute.xlu0 %1222  ;;  %v1236_v17 = vpop.permute.xlu1 %1235 }
 0x657   :  { %v1227_v5 = vadd.f32 %v1223_v41, %v1213_v62  ;;  %v1228_v10 = vadd.f32 %v1223_v41, %v1214_v8 }
 0x659   :  { %1773 = vtanh.f32 %v1227_v5  ;;  %v1786_v5 = vld [vmem:[#allocation5 + $0x8] sm:$0xff] }
 0x65a   :  { %1775 = vtanh.f32 %v1228_v10  ;;  %v1389_v19 = vpop.permute.xlu0 %1388  ;;  %v1391_v20 = vpop.permute.xlu1 %1390 }
 0x65b   :  { %v1770_v11 = vpop.eup %1769 }
 0x65c   :  { %v1772_v7 = vpop.eup %1771 }
 0x663   :  { %v1774_v13 = vpop.eup %1773 }
 0x664   :  { %v1776_v14 = vpop.eup %1775  ;;  %v1601_v16 = vpack.c.bf16 %v1774_v13, %v1770_v11 }
 0x665   :  { %v1599_v18 = vpack.c.bf16 %v1776_v14, %v1772_v7 }
 0x667   :  { %1600 = vmatprep.subr.bf16.mxu0 %v1599_v18 }
 0x668   :  { %1602 = vmatpush1.bf16.msra.mxu0 %v1601_v16 }
 0x669   :  { %1396 = vmatprep.subr.mxu0 %v1966_v1 }
 0x66b   :  { %1559 = vmatmul.mubr.msk.f32.vlgmr.msra.gmra.mrb[8].mxu0 %vm309_vm12, %v1234_v15 }
 0x66c   :  { %1311 = vmatprep.mubr.f32.mxu0 %v1888_v0  ;;  %1397 = vmatpush1.msra.mxu0 %v1968_v2 }
 0x66f   :  { %1560 = vmatmul.mubr.msk.f32.gmra.mrb[10].mxu0 %vm309_vm12, %v1236_v17 }
 0x670   :  { %1460 = vmatprep.mubr.f32.mxu0 %v1888_v0 }
 0x673   :  { %1561 = vmatmul.mubr.msk.f32.vlgmr.msra.gmra.mrb[12].mxu0 %vm60_vm0, %v1389_v19 }
 0x674   :  { %1466 = vmatprep.mubr.f32.mxu0 %v1888_v0 }
 0x677   :  { %1562 = vmatmul.mubr.msk.f32.gmra.mrb[14].mxu0 %vm60_vm0, %v1391_v20 }
 0x73e   :  { %v2331_v1 = vpop.f32.mrb[8].mxu0 }
 0x73f   :  { %v2333_v21 = vpop.f32.mrb[9].mxu0  ;;  %v1324_v22 = vmul.f32 %v2331_v1, %v2331_v1 }
 0x740   :  { %v1318_v2 = vadd.f32 %v2333_v21, %v2331_v1  ;;  %v1325_v23 = vmul.f32 %v2333_v21, %v2333_v21 }
 0x742   :  { %1319 = vadd.xlane.f32.xlu0 %v1318_v2  ;;  %v2341_v24 = vpop.f32.mrb[10].mxu0  ;;  %v1328_v25 = vadd.f32 %v1325_v23, %v1324_v22 }
 0x743   :  { %v2343_v0 = vpop.f32.mrb[11].mxu0  ;;  %v1326_v26 = vmul.f32 %v2341_v24, %v2341_v24 }
 0x744   :  { %v1321_v28 = vadd.f32 %v2343_v0, %v2341_v24  ;;  %v1327_v29 = vmul.f32 %v2343_v0, %v2343_v0 }
 0x746   :  { %1329 = vadd.xlane.f32.xlu0 %v1328_v25  ;;  %1322 = vadd.xlane.f32.xlu1 %v1321_v28  ;;  %v1331_v31 = vadd.f32 %v1327_v29, %v1326_v26  ;;  %v2351_v33 = vpop.f32.mrb[12].mxu0 }
 0x747   :  { %v2353_v34 = vpop.f32.mrb[13].mxu0  ;;  %v1479_v27 = vmul.f32 %v2351_v33, %v2351_v33 }
 0x748   :  { %v1473_v35 = vadd.f32 %v2353_v34, %v2351_v33  ;;  %v1480_v38 = vmul.f32 %v2353_v34, %v2353_v34 }
 0x74a   :  { %1332 = vadd.xlane.f32.xlu0 %v1331_v31  ;;  %1474 = vadd.xlane.f32.xlu1 %v1473_v35  ;;  %v1483_v39 = vadd.f32 %v1480_v38, %v1479_v27  ;;  %v2361_v40 = vpop.f32.mrb[14].mxu0 }
 0x74b   :  { %v2363_v42 = vpop.f32.mrb[15].mxu0  ;;  %v1481_v63 = vmul.f32 %v2361_v40, %v2361_v40 }
 0x74c   :  { %v1476_v58 = vadd.f32 %v2363_v42, %v2361_v40  ;;  %v1482_v60 = vmul.f32 %v2363_v42, %v2363_v42 }
 0x74e   :  { %v1486_v57 = vadd.f32 %v1482_v60, %v1481_v63 }
 0x7cf   :  { %v1320_v3 = vpop.xlane.xlu0 %1319 }
 0x7d0   :  { %v1334_v43 = vmul.f32 0.00390625, %v1320_v3 }
 0x7d2   :  { %v1338_v46 = vmul.f32 %v1334_v43, %v1334_v43 }
 0x7d3   :  { %v1330_v44 = vpop.xlane.xlu0 %1329  ;;  %v1323_v45 = vpop.xlane.xlu1 %1322 }
 0x7d4   :  { %v1336_v49 = vmul.f32 0.00390625, %v1330_v44  ;;  %v1335_v52 = vmul.f32 0.00390625, %v1323_v45 }
 0x7d6   :  { %v1340_v53 = vsub.f32 %v1336_v49, %v1338_v46  ;;  %v1339_v54 = vmul.f32 %v1335_v52, %v1335_v52 }
 0x7d7   :  { %v1333_v55 = vpop.xlane.xlu0 %1332  ;;  %v1475_v37 = vpop.xlane.xlu1 %1474 }
 0x7d8   :  { %v1342_v9 = vadd.f32 1e-05, %v1340_v53  ;;  %v1337_v50 = vmul.f32 0.00390625, %v1333_v55  ;;  %v1489_v7 = vmul.f32 0.00390625, %v1475_v37 }
 0x7da   :  { %1777 = vrsqrt.f32 %v1342_v9  ;;  %v1341_v51 = vsub.f32 %v1337_v50, %v1339_v54  ;;  %v1493_v16 = vmul.f32 %v1489_v7, %v1489_v7 }
 0x7dc   :  { %v1343_v61 = vadd.f32 1e-05, %v1341_v51 }
 0x7de   :  { %1779 = vrsqrt.f32 %v1343_v61 }
 0x7e4   :  { %v1778_v12 = vpop.eup %1777 }
 0x7e5   :  { %v1346_v36 = vmul.f32 %v1778_v12, %v1972_v4  ;;  %v1785_v4 = vld [vmem:[#allocation5] sm:$0xff] }
 0x7e7   :  { %v1348_v30 = vmul.f32 %v1346_v36, %v1334_v43 }
 0x7e8   :  { %v1780_v56 = vpop.eup %1779 }
 0x7e9   :  { %1352 = vrot.lane.b32.xlu0 %v1348_v30, %s1891_s2  ;;  %v1347_v47 = vmul.f32 %v1780_v56, %v1977_v6 }
 0x7eb   :  { %v1349_v48 = vmul.f32 %v1347_v47, %v1335_v52 }
 0x7ed   :  { %1354 = vrot.lane.b32.xlu1 %v1349_v48, %s1891_s2 }
 0x808   :  { %1477 = vadd.xlane.f32.xlu0 %v1476_v58 }
 0x80c   :  { %1484 = vadd.xlane.f32.xlu0 %v1483_v39 }
 0x811   :  { %1487 = vadd.xlane.f32.xlu1 %v1486_v57 }
 0x822   :  { %1362 = vperm.xlu0 %1745, %v1346_v36   ;;  %1367 = vperm.xlu1 %1746, %v1347_v47  }
 0x826   :  { %1747 = vset.pattern.permute.xlu1 %v1903_v32  ;;  %1748 = vset.pattern.permute.xlu0 %v1903_v32 }
 0x85b   :  { %v1353_v62 = vpop.permute.xlu0 %1352 }
 0x85c   :  { %v1358_v8 = vsub.f32 %v1785_v4, %v1353_v62 }
 0x85e   :  { %1376 = vperm.xlu1 %1747, %v1358_v8  }
 0x85f   :  { %v1355_v41 = vpop.permute.xlu1 %1354 }
 0x860   :  { %v1359_v10 = vsub.f32 %v1786_v5, %v1355_v41 }
 0x862   :  { %1381 = vperm.xlu1 %1747, %v1359_v10  }
 0x895   :  { %v1478_v6 = vpop.xlane.xlu0 %1477 }
 0x896   :  { %v1490_v14 = vmul.f32 0.00390625, %v1478_v6 }
 0x898   :  { %v1494_v17 = vmul.f32 %v1490_v14, %v1490_v14 }
 0x899   :  { %v1485_v11 = vpop.xlane.xlu0 %1484 }
 0x89a   :  { %v1491_v13 = vmul.f32 0.00390625, %v1485_v11 }
 0x89c   :  { %v1495_v15 = vsub.f32 %v1491_v13, %v1493_v16 }
 0x89e   :  { %v1488_v18 = vpop.xlane.xlu1 %1487  ;;  %v1497_v20 = vadd.f32 1e-05, %v1495_v15 }
 0x89f   :  { %v1492_v19 = vmul.f32 0.00390625, %v1488_v18 }
 0x8a0   :  { %1781 = vrsqrt.f32 %v1497_v20 }
 0x8a1   :  { %v1496_v22 = vsub.f32 %v1492_v19, %v1494_v17  ;;  %v1363_v28 = vpop.permute.xlu0 %1362 }
 0x8a2   :  { %v1368_v29 = vpop.permute.xlu1 %1367  ;;  %v1370_v38 = vmul.f32 %v1363_v28, %v2331_v1  ;;  %v1371_v39 = vmul.f32 %v1363_v28, %v2333_v21 }
 0x8a3   :  { %v1498_v2 = vadd.f32 1e-05, %v1496_v22  ;;  %v1372_v44 = vmul.f32 %v1368_v29, %v2341_v24  ;;  %v1373_v45 = vmul.f32 %v1368_v29, %v2343_v0 }
 0x8a5   :  { %1783 = vrsqrt.f32 %v1498_v2 }
 0x8aa   :  { %v1782_v23 = vpop.eup %1781 }
 0x8ab   :  { %v1501_v25 = vmul.f32 %v1782_v23, %v1489_v7  ;;  %v1505_v27 = vmul.f32 %v1782_v23, %v2351_v33  ;;  %v1506_v58 = vmul.f32 %v1782_v23, %v2353_v34 }
 0x8ad   :  { %v1503_v31 = vsub.f32 0.0, %v1501_v25 }
 0x8af   :  { %v1784_v26 = vpop.eup %1783  ;;  %v1509_v63 = vadd.f32 %v1505_v27, %v1503_v31  ;;  %v1510_v3 = vadd.f32 %v1506_v58, %v1503_v31 }
 0x8b0   :  { %v1502_v35 = vmul.f32 %v1784_v26, %v1490_v14  ;;  %v1507_v33 = vmul.f32 %v1784_v26, %v2361_v40  ;;  %v1508_v1 = vmul.f32 %v1784_v26, %v2363_v42 }
 0x8b2   :  { %v1504_v43 = vsub.f32 0.0, %v1502_v35 }
 0x8b4   :  { %v1511_v53 = vadd.f32 %v1507_v33, %v1504_v43  ;;  %v1512_v54 = vadd.f32 %v1508_v1, %v1504_v43 }
 0x8dd   :  { %v1377_v60 = vpop.permute.xlu1 %1376 }
 0x8de   :  { %v1384_v57 = vadd.f32 %v1377_v60, %v1370_v38  ;;  %v1385_v59 = vadd.f32 %v1377_v60, %v1371_v39 }
 0x8e0   :  { %v1513_v46 = vadd.f32 %v1509_v63, %v1384_v57  ;;  %v1514_v49 = vadd.f32 %v1510_v3, %v1385_v59 }
 0x8e1   :  { %v1382_v52 = vpop.permute.xlu1 %1381 }
 0x8e2   :  { %1517 = vst [vmem:[#allocation8] sm:$0xff] %v1513_v46  ;;  %1518 = vst [vmem:[#allocation8 + $0x8] sm:$0xff] %v1514_v49  ;;  %v1386_v21 = vadd.f32 %v1382_v52, %v1372_v44  ;;  %v1387_v34 = vadd.f32 %v1382_v52, %v1373_v45 }
 0x8e4   :  { %v1515_v55 = vadd.f32 %v1511_v53, %v1386_v21  ;;  %v1516_v9 = vadd.f32 %v1512_v54, %v1387_v34 }
 0x8e6   :  { %1519 = vst [vmem:[#allocation8 + $0x10] sm:$0xff] %v1515_v55  ;;  %1520 = vst [vmem:[#allocation8 + $0x18] sm:$0xff] %v1516_v9 }
 0x8e7   :  { %1864 = shalt.err (!%p1861_p0)
}
 0x8e8   :  { %s1865_s9 = scalar_lea.hbm %s2401_s3, 512 }
 0x8e9   :  { %p1866_p1 = scmp.ne.s32.totalorder %s2401_s3, %s1865_s9  ;;  %p1869_p2 = scmp.lt.u32.totalorder %s1865_s9, %s2401_s3 }
 0x8eb   :  { %p1871_p3 = pnand %p1869_p2, %p1866_p1 }
 0x8ed   :  { %1874 = shalt.err (!%p1871_p3)
}
 0x8ee   :  { %1532 = dma.vmem_to_hbm [thread:$0]  %s1527_s5, 512, %s2401_s3, [#allocation4], %s1886_s0, %s1886_s0, %s1887_s20  }
 0x8ef   :  { %1879 = dma.done.wait [#allocation4], 512  }
 0x8f0   :  { %1880 = vsyncadd [#allocation4], 4294966784 }
 0x8f1   :  { %1536 = vsyncpa [#allocation3], 1 }
 0x8f2   :  { %1537 = vsyncpa [#allocation6], 1 }
 0x8f3   :  { %1538 = vsyncpa [#allocation4], 1 }

</bundles_post_ra>
